<compile_context>
chip_gen: v5e
topology: v5e:2x2
jax: 0.10.0
libtpu: 0.0.40
codegen_flags: <defaults>
</compile_context>

<pallas_src>
import jax
import jax.numpy as jnp
import numpy as np
from jax.experimental import pallas as pl
from jax.experimental.pallas import tpu as pltpu


def _round_up(x, m):
    return ((x + m - 1) // m) * m


def _fused_feature_kernel(x_ref, g_ref, pin_ref, bias_ref, pout_ref,
                          out_ref, acc_ref):
    """acc += (x @ pin + bias) * (g @ pout); emit at last layer."""
    layer = pl.program_id(2)

    @pl.when(layer == 0)
    def _():
        acc_ref[...] = jnp.zeros_like(acc_ref)

    x = x_ref[0]          # (tn, Kin)
    g = g_ref[0]          # (tn, Kout)
    pin = pin_ref[0]      # (Kin, tr)
    pout = pout_ref[0]    # (Kout, tr)
    bias = bias_ref[0]    # (1, tr)  -- folded ones-column projection row

    f = jnp.dot(x, pin, preferred_element_type=jnp.float32) + bias.astype(jnp.float32)
    gp = jnp.dot(g, pout, preferred_element_type=jnp.float32)
    acc_ref[...] += f * gp

    @pl.when(layer == pl.num_programs(2) - 1)
    def _():
        out_ref[...] = acc_ref[...].astype(out_ref.dtype)


def feature_calculator_local_full_g(layer_inputs, layer_grads,
                                    in_feat_projs, out_grad_projs,
                                    n_random_features, *,
                                    tn=256, tr=512,
                                    matmul_dtype=None, out_dtype=None):
    """FeatureCalculator._compute_feature with kernel='local-full-g'.

    layer_inputs[i]:   [N_atoms, in_features_i]   (pre-hook captured inputs)
    layer_grads[i]:    [N_atoms, out_features_i]  (backward-hook gradients)
    in_feat_projs[i]:  [in_features_i + 1, n_random_features]
    out_grad_projs[i]: [out_features_i, n_random_features]
    returns:           [N_atoms, n_random_features]

    matmul_dtype: optionally cast matmul inputs (e.g. jnp.bfloat16) for v5e/v6e
    MXU throughput; accumulation is always f32.
    """
    assert tr % 128 == 0
    num_layers = len(layer_inputs)
    n_atoms = layer_inputs[0].shape[0]
    r = n_random_features
    out_dtype = out_dtype or layer_inputs[0].dtype
    comp_dtype = matmul_dtype or layer_inputs[0].dtype

    # Common padded per-layer widths (K is tiny, padding is cheap & exact: zeros).
    k_in = _round_up(max(x.shape[1] for x in layer_inputs), 8)
    k_out = _round_up(max(g.shape[1] for g in layer_grads), 8)

    # Row / random-feature tiling (padded to tile multiples, sliced back at end).
    tn_eff = min(tn, _round_up(n_atoms, 8))
    n_pad = _round_up(n_atoms, tn_eff)
    r_pad = _round_up(r, 128)
    tr_eff = min(tr, r_pad)
    r_pad = _round_up(r_pad, tr_eff)

    def pad2(a, rows, cols):
        return jnp.pad(a, ((0, rows - a.shape[0]), (0, cols - a.shape[1])))

    x_stack = jnp.stack(
        [pad2(x.astype(comp_dtype), n_pad, k_in) for x in layer_inputs])
    g_stack = jnp.stack(
        [pad2(g.astype(comp_dtype), n_pad, k_out) for g in layer_grads])
    # Split the ones-column (FeatureExtractor hook) into a bias row: last row
    # of in_proj is the bias, remaining rows are the weight projection.
    pin_stack = jnp.stack(
        [pad2(p[:-1].astype(comp_dtype), k_in, r_pad) for p in in_feat_projs])
    bias_stack = jnp.stack(
        [pad2(p[-1:].astype(jnp.float32), 1, r_pad) for p in in_feat_projs])
    pout_stack = jnp.stack(
        [pad2(p.astype(comp_dtype), k_out, r_pad) for p in out_grad_projs])

    grid = (n_pad // tn_eff, r_pad // tr_eff, num_layers)

    grid_spec = pltpu.PrefetchScalarGridSpec(
        num_scalar_prefetch=0,
        grid=grid,
        in_specs=[
            pl.BlockSpec((1, tn_eff, k_in), lambda i, j, k: (k, i, 0)),   # x
            pl.BlockSpec((1, tn_eff, k_out), lambda i, j, k: (k, i, 0)),  # grad
            pl.BlockSpec((1, k_in, tr_eff), lambda i, j, k: (k, 0, j)),   # in_proj
            pl.BlockSpec((1, 1, tr_eff), lambda i, j, k: (k, 0, j)),      # bias row
            pl.BlockSpec((1, k_out, tr_eff), lambda i, j, k: (k, 0, j)),  # out_proj
        ],
        out_specs=pl.BlockSpec((tn_eff, tr_eff), lambda i, j, k: (i, j)),
        scratch_shapes=[pltpu.VMEM((tn_eff, tr_eff), jnp.float32)],
    )

    out = pl.pallas_call(
        _fused_feature_kernel,
        out_shape=jax.ShapeDtypeStruct((n_pad, r_pad), out_dtype),
        grid_spec=grid_spec,
        compiler_params=pltpu.CompilerParams(
            dimension_semantics=("parallel", "parallel", "arbitrary"),
            vmem_limit_bytes=32 * 1024 * 1024,
        ),
    )(x_stack, g_stack, pin_stack, bias_stack, pout_stack)

    return out[:n_atoms, :r]


def _reference(layer_inputs, layer_grads, in_feat_projs, out_grad_projs, r):
    n = layer_inputs[0].shape[0]
    acc = jnp.zeros((n, r), dtype=jnp.float32)
    for x_in, grad, in_proj, out_proj in zip(layer_inputs, layer_grads,
                                             in_feat_projs, out_grad_projs):
        feat = jnp.concatenate(
            [x_in, jnp.ones((x_in.shape[0], 1), dtype=x_in.dtype)], axis=-1)
        acc = acc + (feat @ in_proj) * (grad @ out_proj)
    return acc


if __name__ == "__main__":
    # Small synthetic setup consistent with the module:
    #   readout MLP with two nn.Linear layers: 32 -> 16 -> 1
    #   n_random_features = 128, N_atoms = 16
    N_ATOMS = 16
    N_RANDOM = 128
    layer_dims = [(32, 16), (16, 1)]   # (in_features, out_features) per Linear

    key = jax.random.PRNGKey(0)
    keys = iter(jax.random.split(key, 16))

    # Hook-captured data (synthetic): layer inputs and output gradients.
    layer_inputs = [
        jax.random.normal(next(keys), (N_ATOMS, d_in), dtype=jnp.float32)
        for d_in, _ in layer_dims
    ]
    layer_grads = [
        jax.random.normal(next(keys), (N_ATOMS, d_out), dtype=jnp.float32)
        for _, d_out in layer_dims
    ]
    # RandomProjections buffers (deterministic Gaussian init).
    in_feat_projs = [
        jax.random.normal(next(keys), (d_in + 1, N_RANDOM), dtype=jnp.float32)
        for d_in, _ in layer_dims
    ]
    out_grad_projs = [
        jax.random.normal(next(keys), (d_out, N_RANDOM), dtype=jnp.float32)
        for _, d_out in layer_dims
    ]

    out = feature_calculator_local_full_g(layer_inputs, layer_grads,
                                          in_feat_projs, out_grad_projs,
                                          N_RANDOM)
    out = jax.block_until_ready(out)

    ref = _reference(layer_inputs, layer_grads, in_feat_projs, out_grad_projs,
                     N_RANDOM)
    np.testing.assert_allclose(np.asarray(out), np.asarray(ref),
                               rtol=1e-5, atol=1e-5)

    # TODO(synk): compute_maha_dist / scatter_mean path not implemented
    # (default compute_maha_dist=False; requires dataset-derived precision).
    print("KERNEL_OK")
</pallas_src>

<mosaic_0001>
module attributes {stable_mosaic.version = 11 : i64} {
  func.func @_fused_feature_kernel(%arg0: i32, %arg1: i32, %arg2: i32, %arg3: memref<1x16x32xf32, #tpu.memory_space<vmem>>, %arg4: memref<1x16x16xf32, #tpu.memory_space<vmem>>, %arg5: memref<1x32x128xf32, #tpu.memory_space<vmem>>, %arg6: memref<1x1x128xf32, #tpu.memory_space<vmem>>, %arg7: memref<1x16x128xf32, #tpu.memory_space<vmem>>, %arg8: memref<16x128xf32, #tpu.memory_space<vmem>>, %arg9: memref<16x128xf32, #tpu.memory_space<vmem>>) attributes {dimension_semantics = [#tpu.dimension_semantics<parallel>, #tpu.dimension_semantics<parallel>, #tpu.dimension_semantics<arbitrary>], iteration_bounds = array<i64: 1, 1, 2>, scalar_prefetch = 0 : i64, scratch_operands = 1 : i64, tpu.core_type = #tpu.core_type<tc>, window_params = [{transform_indices = @transform_0, window_bounds = array<i64: 1, 16, 32>}, {transform_indices = @transform_1, window_bounds = array<i64: 1, 16, 16>}, {transform_indices = @transform_2, window_bounds = array<i64: 1, 32, 128>}, {transform_indices = @transform_3, window_bounds = array<i64: 1, 1, 128>}, {transform_indices = @transform_4, window_bounds = array<i64: 1, 16, 128>}, {transform_indices = @transform_5, window_bounds = array<i64: 16, 128>}]} {
    %c0_i32 = arith.constant 0 : i32
    %0 = arith.cmpi eq, %arg2, %c0_i32 : i32
    %1 = arith.extui %0 : i1 to i32
    %c0_i32_0 = arith.constant 0 : i32
    %2 = arith.cmpi ne, %1, %c0_i32_0 : i32
    scf.if %2 {
      %cst_21 = arith.constant 0.000000e+00 : f32
      %24 = vector.broadcast %cst_21 : f32 to vector<16x128xf32>
      %c0_22 = arith.constant 0 : index
      %c0_23 = arith.constant 0 : index
      %25 = vector.load %arg9[%c0_22, %c0_23] : memref<16x128xf32, #tpu.memory_space<vmem>>, vector<16x128xf32>
      tpu.vector_store %arg9[%c0_22, %c0_23], %24 {strides = array<i32>} : memref<16x128xf32, #tpu.memory_space<vmem>>, vector<16x128xf32>,
    } else {
    }
    %c0 = arith.constant 0 : index
    %c0_1 = arith.constant 0 : index
    %c0_2 = arith.constant 0 : index
    %3 = vector.load %arg3[%c0, %c0_1, %c0_2] : memref<1x16x32xf32, #tpu.memory_space<vmem>>, vector<1x16x32xf32>
    %4 = vector.shape_cast %3 : vector<1x16x32xf32> to vector<16x32xf32>
    %c0_3 = arith.constant 0 : index
    %c0_4 = arith.constant 0 : index
    %c0_5 = arith.constant 0 : index
    %5 = vector.load %arg4[%c0_3, %c0_4, %c0_5] : memref<1x16x16xf32, #tpu.memory_space<vmem>>, vector<1x16x16xf32>
    %6 = vector.shape_cast %5 : vector<1x16x16xf32> to vector<16x16xf32>
    %c0_6 = arith.constant 0 : index
    %c0_7 = arith.constant 0 : index
    %c0_8 = arith.constant 0 : index
    %7 = vector.load %arg5[%c0_6, %c0_7, %c0_8] : memref<1x32x128xf32, #tpu.memory_space<vmem>>, vector<1x32x128xf32>
    %8 = vector.shape_cast %7 : vector<1x32x128xf32> to vector<32x128xf32>
    %c0_9 = arith.constant 0 : index
    %c0_10 = arith.constant 0 : index
    %c0_11 = arith.constant 0 : index
    %9 = vector.load %arg7[%c0_9, %c0_10, %c0_11] : memref<1x16x128xf32, #tpu.memory_space<vmem>>, vector<1x16x128xf32>
    %10 = vector.shape_cast %9 : vector<1x16x128xf32> to vector<16x128xf32>
    %c0_12 = arith.constant 0 : index
    %c0_13 = arith.constant 0 : index
    %c0_14 = arith.constant 0 : index
    %11 = vector.load %arg6[%c0_12, %c0_13, %c0_14] : memref<1x1x128xf32, #tpu.memory_space<vmem>>, vector<1x1x128xf32>
    %12 = vector.shape_cast %11 : vector<1x1x128xf32> to vector<1x128xf32>
    %cst = arith.constant dense<0.000000e+00> : vector<16x128xf32>
    %13 = tpu.matmul %4, %8, %cst {dimension_numbers = #tpu.dot_dimension_numbers<[1], [0], [0], [1], [0, 0, 1, 1], [], []>} : vector<16x32xf32>, vector<32x128xf32>, vector<16x128xf32> -> vector<16x128xf32>
    %14 = vector.broadcast %12 : vector<1x128xf32> to vector<16x128xf32>
    %15 = arith.addf %13, %14 : vector<16x128xf32>
    %cst_15 = arith.constant dense<0.000000e+00> : vector<16x128xf32>
    %16 = tpu.matmul %6, %10, %cst_15 {dimension_numbers = #tpu.dot_dimension_numbers<[1], [0], [0], [1], [0, 0, 1, 1], [], []>} : vector<16x16xf32>, vector<16x128xf32>, vector<16x128xf32> -> vector<16x128xf32>
    %c0_16 = arith.constant 0 : index
    %c0_17 = arith.constant 0 : index
    %17 = vector.load %arg9[%c0_16, %c0_17] : memref<16x128xf32, #tpu.memory_space<vmem>>, vector<16x128xf32>
    %18 = arith.mulf %15, %16 : vector<16x128xf32>
    %19 = arith.addf %17, %18 : vector<16x128xf32>
    %c0_18 = arith.constant 0 : index
    %c0_19 = arith.constant 0 : index
    %20 = vector.load %arg9[%c0_18, %c0_19] : memref<16x128xf32, #tpu.memory_space<vmem>>, vector<16x128xf32>
    tpu.vector_store %arg9[%c0_18, %c0_19], %19 {strides = array<i32>} : memref<16x128xf32, #tpu.memory_space<vmem>>, vector<16x128xf32>,
    %c1_i32 = arith.constant 1 : i32
    %21 = arith.cmpi eq, %arg2, %c1_i32 : i32
    %22 = arith.extui %21 : i1 to i32
    %c0_i32_20 = arith.constant 0 : i32
    %23 = arith.cmpi ne, %22, %c0_i32_20 : i32
    scf.if %23 {
      %c0_21 = arith.constant 0 : index
      %c0_22 = arith.constant 0 : index
      %24 = vector.load %arg9[%c0_21, %c0_22] : memref<16x128xf32, #tpu.memory_space<vmem>>, vector<16x128xf32>
      %c0_23 = arith.constant 0 : index
      %c0_24 = arith.constant 0 : index
      %25 = vector.load %arg8[%c0_23, %c0_24] : memref<16x128xf32, #tpu.memory_space<vmem>>, vector<16x128xf32>
      tpu.vector_store %arg8[%c0_23, %c0_24], %24 {strides = array<i32>} : memref<16x128xf32, #tpu.memory_space<vmem>>, vector<16x128xf32>,
    } else {
    }
    return
  }
  func.func @transform_0(%arg0: i32, %arg1: i32, %arg2: i32) -> (i32, i32, i32) {
    %c0_i32 = arith.constant 0 : i32
    %c0_i32_0 = arith.constant 0 : i32
    return %arg2, %arg0, %c0_i32 : i32, i32, i32
  }
  func.func @transform_1(%arg0: i32, %arg1: i32, %arg2: i32) -> (i32, i32, i32) {
    %c0_i32 = arith.constant 0 : i32
    %c0_i32_0 = arith.constant 0 : i32
    return %arg2, %arg0, %c0_i32 : i32, i32, i32
  }
  func.func @transform_2(%arg0: i32, %arg1: i32, %arg2: i32) -> (i32, i32, i32) {
    %c0_i32 = arith.constant 0 : i32
    %c0_i32_0 = arith.constant 0 : i32
    return %arg2, %c0_i32, %arg1 : i32, i32, i32
  }
  func.func @transform_3(%arg0: i32, %arg1: i32, %arg2: i32) -> (i32, i32, i32) {
    %c0_i32 = arith.constant 0 : i32
    %c0_i32_0 = arith.constant 0 : i32
    return %arg2, %c0_i32, %arg1 : i32, i32, i32
  }
  func.func @transform_4(%arg0: i32, %arg1: i32, %arg2: i32) -> (i32, i32, i32) {
    %c0_i32 = arith.constant 0 : i32
    %c0_i32_0 = arith.constant 0 : i32
    return %arg2, %c0_i32, %arg1 : i32, i32, i32
  }
  func.func @transform_5(%arg0: i32, %arg1: i32, %arg2: i32) -> (i32, i32) {
    %c0_i32 = arith.constant 0 : i32
    return %arg0, %arg1 : i32, i32
  }
}

</mosaic_0001>

<bundles_post_ra>
// kernel: tpu_custom_call.1
= control target key start
LH: loop header
LB: loop body
LE: loop exit
PB: predicated region body
PF: predicated region fallthrough
CT: control target
= control target key end

     0   :  { %s1238_s0 = inlined_call_operand.hbm [shape: f32[2,16,32], index: 0, kind: input, shape index: {}]   ;;  %s1239_s1 = inlined_call_operand.hbm [shape: f32[2,16,16], index: 1, kind: input, shape index: {}]   ;;  %s1240_s2 = inlined_call_operand.hbm [shape: f32[2,32,128], index: 2, kind: input, shape index: {}]   ;;  %s1241_s3 = inlined_call_operand.vmem [shape: f32[2,1,128], index: 3, kind: input, shape index: {}]   ;;  %s1242_s4 = inlined_call_operand.hbm [shape: f32[2,16,128], index: 4, kind: input, shape index: {}]   ;;  %s1243_s5 = inlined_call_operand.hbm [shape: f32[16,128], index: 5, kind: output, shape index: {}]  }
   0x1   :  { %1247 = sst [smem:[#allocation20_spill]] %s1238_s0 }
   0x2   :  { %1248 = sst [smem:[#allocation21_spill]] %s1239_s1 }
   0x3   :  { %10 = vsyncpa [#allocation4], 0 }
   0x4   :  { %12 = vsyncpa [#allocation4 + $0x1], 0 }
   0x5   :  { %13 = vsyncpa [#allocation7], 0 }
   0x6   :  { %15 = vsyncpa [#allocation7 + $0x1], 0 }
   0x7   :  { %16 = vsyncpa [#allocation10], 0 }
   0x8   :  { %18 = vsyncpa [#allocation10 + $0x1], 0 }
   0x9   :  { %19 = vsyncpa [#allocation5], 0  ;;  %s1060_s18 = smov 0   ;;  %s1062_s19 = smov 0  }
   0xa   :  { %s1064_s20 = smov 0   ;;  %s1066_s21 = smov 0  }
   0xb   :  { %s1068_s22 = smov 0   ;;  %s1070_s23 = smov 0  }
   0xc LB: > { %1249 = sst [smem:[#allocation16_spill]] %s1010_s20  ;;  %s1089_s24 = sadd.s32 4294967295, %s1022_s23   ;;  %s1022_s23 = sphi %s1070_s23, %s25_s23   ;;  %s1018_s22 = sphi %s1068_s22, %s1261_s22   ;;  %s1014_s21 = sphi %s1066_s21, %s1264_s21   ;;  %s1010_s20 = sphi %s1064_s20, %s1259_s20   ;;  %s1006_s19 = sphi %s1062_s19, %s1263_s19   ;;  %s1002_s18 = sphi %s1060_s18, %s1262_s18  }
   0xd   : > { %1250 = sst [smem:[#allocation17_spill]] %s1018_s22  ;;  %s37_s25 = sadd.s32 1, %s1018_s22 }
   0xe   : > { %p38_p0 = scmp.ge.s32.totalorder %s37_s25, 2  ;;  %s53_s26 = sadd.s32 1, %s1010_s20 }
   0xf   : > { %p60_p1 = scmp.ne.s32.totalorder %s1010_s20, %s1006_s19  ;;  %p61_p2 = scmp.eq.s32.totalorder %s1022_s23, 0 }
  0x10   : > { %s1266_s25 = smov (%p38_p0, %s37_s25), 0  ;;  %p66_p4 = scmp.ne.s32.totalorder %s1006_s19, %s1002_s18 }
  0x11   : > { %1251 = sst [smem:[#allocation18_spill]] %s1266_s25  ;;  %p62_p3 = por %p61_p2, %p60_p1 }
  0x12   : > { %s48_s27 = ssub.s32 %s1018_s22, %s1266_s25  ;;  %p67_p5 = scmp.eq.s32.totalorder %s1089_s24, 0 }
  0x13   : > { %p51_p6 = scmp.eq.s32.totalorder %s48_s27, 0  ;;  %p754_p8 = scmp.lt.s32.totalorder %s1022_s23, 2 }
  0x14   : > { %p1102_p7 = por %p67_p5, %p66_p4  ;;  %s1111_s30 = sand.u32 1, %s1010_s20  }
  0x15   : > { %s1108_s29 = scalar_select %p51_p6, %s1010_s20, %s53_s26  }
  0x16   : > { %s1114_s6 = sshll.u32 %s1018_s22, 4  ;;  %s1117_s7 = sshll.u32 %s1111_s30, 4 }
  0x17   : > { %1253 = sst [smem:[#allocation19_spill]] %s1108_s29  ;;  %p1119_p9 = pnand %p754_p8, %p62_p3 }
  0x18   : > { %s254_s9 = sand.u32 1, %s1022_s23   ;;  %s1255_s1 = sld [smem:[#allocation21_spill]] }
  0x19   : > { %s258_s13 = scalar_lea.vmem [#allocation6], %s1117_s7  ;;  %p704_p10 = scmp.ge.s32.totalorder %s1022_s23, 1 }
  0x1a   : > { %s268_s14 = sshll.u32 %s258_s13, 4  ;;  %s255_s16 = scalar_lea.sflag [#allocation7], %s254_s9  ;;  %s269_s14 = int_to_ptr.vmem [resolvable:$true] %s268_s14 }
  0x1b   : > { %s1024_s17 = smov 128   ;;  %s1025_s18 = smov 8  }
  0x1c   : > { %p331_p11 = scmp.lt.s32.totalorder %s1022_s23, 3  ;;  %s1257_s0 = sld [smem:[#allocation20_spill]] }
  0x1d   : > { %s231_s25 = scalar_lea.sflag [#allocation4], %s1111_s30 }
  0x1e   : > { %s265_s12 = scalar_lea.hbm %s1255_s1, %s1114_s6  ;;  %p1136_p12 = pnand %p704_p10, %p331_p11 }
  0x1f   : > { %s266_s15 = sshll.u32 %s265_s12, 4  ;;  %s234_s12 = scalar_lea.vmem [#allocation3], %s1117_s7  ;;  %s267_s15 = int_to_ptr.hbm [resolvable:$true] %s266_s15 }
  0x20   : > { %747 = dma.hbm_to_vmem [thread:$0]  (!%p1119_p9), %s267_s15, 256, %s269_s14, %s255_s16, %s1024_s17, %s1024_s17, %s1025_s18  }
  0x21   : > { %s244_s9 = sshll.u32 %s234_s12, 4  ;;  %s698_s1 = sshll.u32 %s1111_s30, 5  ;;  %s245_s9 = int_to_ptr.vmem [resolvable:$true] %s244_s9 }
  0x22   : > { %s241_s11 = scalar_lea.hbm %s1257_s0, %s1114_s6  ;;  %s721_s14 = sshll.u32 %s1018_s22, 5 }
  0x23   : > { %s242_s13 = sshll.u32 %s241_s11, 4  ;;  %s288_s10 = scalar_lea.hbm %s1240_s2, %s721_s14  ;;  %s243_s13 = int_to_ptr.hbm [resolvable:$true] %s242_s13 }
  0x24   : > { %744 = dma.hbm_to_vmem [thread:$0]  (!%p1119_p9), %s243_s13, 256, %s245_s9, %s231_s25, %s1024_s17, %s1024_s17, %s1025_s18  }
  0x25   : > { %s282_s0 = scalar_lea.vmem [#allocation8], %s698_s1  ;;  %s289_s11 = sshll.u32 %s288_s10, 4  ;;  %s290_s11 = int_to_ptr.hbm [resolvable:$true] %s289_s11 }
  0x26   : > { %s291_s12 = sshll.u32 %s282_s0, 4  ;;  %s320_s25 = scalar_lea.hbm %s1242_s4, %s1114_s6  ;;  %s292_s12 = int_to_ptr.vmem [resolvable:$true] %s291_s12 }
  0x27   : > { %750 = dma.hbm_to_vmem [thread:$0]  (!%p1119_p9), %s290_s11, 512, %s292_s12, %s255_s16, %s1024_s17, %s1024_s17, %s1025_s18  }
  0x28   : > { %s321_s9 = sshll.u32 %s320_s25, 4  ;;  %s314_s13 = scalar_lea.vmem [#allocation9], %s1117_s7  ;;  %s322_s9 = int_to_ptr.hbm [resolvable:$true] %s321_s9 }
  0x29   : > { %s323_s22 = sshll.u32 %s314_s13, 4  ;;  %s311_s14 = scalar_lea.sflag [#allocation10], %s1111_s30  ;;  %s324_s22 = int_to_ptr.vmem [resolvable:$true] %s323_s22 }
  0x2a   : > { %753 = dma.hbm_to_vmem [thread:$0]  (!%p1119_p9), %s322_s9, 256, %s324_s22, %s311_s14, %s1024_s17, %s1024_s17, %s1025_s18  }
  0x2b   : > { %335 = sbr.rel (%p1136_p12) target bundleno = 227 (0xe3), region = 40  ;;  %s337_s0 = sand.u32 (!%p1136_p12), 1, %s1006_s19  }
  0x2c   : > { %s1175_s1 = sshll.u32 (!%p1136_p12), %s337_s0, 4  ;;  %s338_s20 = scalar_lea.sflag (!%p1136_p12), [#allocation4], %s337_s0 }
  0x2d   : > { %s341_s29 = scalar_lea.vmem (!%p1136_p12), [#allocation3], %s1175_s1 }
  0x30   : > { %985 = dma.done.wait (%p1102_p7), %s338_s20, 256  }
  0x31   : > { %987 = vsyncadd (%p1102_p7), %s338_s20, 4294967040  ;;  %s347_s22 = sand.u32 1, %s1089_s24   ;;  %s351_s6 = scalar_lea.vmem [#allocation6], %s1175_s1 }
  0x32   : > { %s348_s30 = scalar_lea.sflag [#allocation7], %s347_s22 }
  0x33   : > { %989 = dma.done.wait (%p1102_p7), %s348_s30, 768  }
  0x34   : > { %991 = vsyncadd (%p1102_p7), %s348_s30, 4294966528  ;;  %s707_s7 = sshll.u32 %s337_s0, 5  ;;  %s368_s16 = scalar_lea.sflag [#allocation10], %s337_s0 }
  0x35   : > { %s361_s8 = scalar_lea.vmem [#allocation8], %s707_s7  ;;  %s371_s17 = scalar_lea.vmem [#allocation9], %s1175_s1 }
  0x36   : > { %993 = dma.done.wait (%p1102_p7), %s368_s16, 256  }
  0x37   : > { %995 = vsyncadd (%p1102_p7), %s368_s16, 4294967040  ;;  %p417_p13 = scmp.lt.s32.totalorder %s1014_s21, 1  ;;  %p709_p0 = scmp.ne.s32.totalorder %s1014_s21, 0 }
  0x39   : > { %s1195_s18 = scalar_select %p417_p13, %s1014_s21, 1 }
  0x3a   : > { %427 = sbr.rel (%p709_p0) target bundleno = 66 (0x42), region = 60 }
  0x3b   : > { %s422_s27 = scalar_lea.vmem %s1241_s3, %s1195_s18 }
  0x3f   : > { %v1026_v0 = vmov 0.0  }
  0x40   : > { %428 = vst [vmem:[#allocation2] sm:$0xff] %v1026_v0 }
  0x41   : > { %429 = vst [vmem:[#allocation2 + $0x8] sm:$0xff] %v1026_v0 }
  0x42 PF: > { %v437_v1 = vld [vmem:[%s361_s8 + $0x18] sm:$0xff]  ;;  %v436_v2 = vld [vmem:[%s361_s8 + $0x10] sm:$0xff]  ;;  %v435_v4 = vld [vmem:[%s361_s8 + $0x8] sm:$0xff]  ;;  %vm474_vm0 = vcmask 130048   ;;  %vm444_vm1 = vcmask 261120   ;;  %p714_p1 = scmp.ne.s32.totalorder %s1014_s21, 1 }
  0x43   : > { %723 = vmatpush.msra.mxu2 %v437_v1  ;;  %463 = vmatpush.msra.mxu0 %v437_v1  ;;  %v439_v3 = vld [vmem:[%s371_s17 + $0x8] sm:$0xff]  ;;  %v438_v5 = vld [vmem:[%s371_s17] sm:$0xff] }
  0x44   : > { %727 = vmatpush.msra.mxu3 %v439_v3  ;;  %v433_v6 = vld [vmem:[%s351_s6 + $0x8] sm:$0xff]  ;;  %495 = vmatpush.msra.mxu1 %v439_v3  ;;  %v432_v7 = vld [vmem:[%s351_s6] sm:$0xff] }
  0x45   : > { %724 = vmatpush.msra.mxu2 %v436_v2  ;;  %464 = vmatpush.msra.mxu0 %v436_v2  ;;  %v434_v8 = vld [vmem:[%s361_s8] sm:$0xff]  ;;  %v431_v9 = vld [vmem:[%s341_s29 + $0x8] sm:$0xff]  ;;  %v811_v11 = vld [vmem:[%s422_s27] ss:$0 sm:$0xff] }
  0x46   : > { %728 = vmatpush.msra.mxu3 %v438_v5  ;;  %496 = vmatpush.msra.mxu1 %v438_v5  ;;  %v430_v10 = vld [vmem:[%s341_s29] sm:$0xff] }
  0x47   : > { %725 = vmatpush.msra.mxu2 %v435_v4  ;;  %713 = vmatmul.msk.f32.vlgmr.msra.gmra.mxu3 %vm474_vm0, %v433_v6  ;;  %v504_v15 = vld [vmem:[#allocation2] sm:$0xff] }
  0x48   : > { %465 = vmatpush.msra.mxu0 %v435_v4  ;;  %712 = vmatmul.msk.f32.vlgmr.msra.gmra.mxu1 %vm474_vm0, %v432_v7  ;;  %v505_v21 = vld [vmem:[#allocation2 + $0x8] sm:$0xff] }
  0x49   : > { %726 = vmatpush.msra.mxu2 %v434_v8 }
  0x4a   : > { %711 = vmatmul.msk.f32.vlgmr.msra.gmra.mxu2 %vm444_vm1, %v431_v9  ;;  %466 = vmatpush.msra.mxu0 %v434_v8 }
  0x4b   : > { %710 = vmatmul.msk.f32.vlgmr.msra.gmra.mxu0 %vm444_vm1, %v430_v10 }
  0xc5   : > { %v498_v13 = vpop.f32.mrf.mxu1 }
  0xc8   : > { %v468_v12 = vpop.f32.mrf.mxu0 }
  0xc9   : > { %v469_v14 = vadd.f32 %v811_v11, %v468_v12 }
  0xca   : > { %v501_v19 = vpop.f32.mrf.mxu3 }
  0xcb   : > { %v506_v16 = vmul.f32 %v498_v13, %v469_v14 }
  0xcd   : > { %v471_v17 = vpop.f32.mrf.mxu2  ;;  %v508_v18 = vadd.f32 %v506_v16, %v504_v15 }
  0xce   : > { %v472_v20 = vadd.f32 %v811_v11, %v471_v17 }
  0xcf   : > { %510 = vst [vmem:[#allocation2] sm:$0xff] %v508_v18 }
  0xd0   : > { %v507_v22 = vmul.f32 %v501_v19, %v472_v20  ;;  %515 = sbr.rel (%p714_p1) target bundleno = 221 (0xdd), region = 64 }
  0xd2   : > { %v509_v23 = vadd.f32 %v507_v22, %v505_v21 }
  0xd4   : > { %511 = vst [vmem:[#allocation2 + $0x8] sm:$0xff] %v509_v23 }
  0xd6   : > { %v516_v24 = vld [vmem:[#allocation2] sm:$0xff] }
  0xd7   : > { %518 = vst [vmem:[#allocation11] sm:$0xff] %v516_v24 }
  0xdb   : > { %v517_v25 = vld [vmem:[#allocation2 + $0x8] sm:$0xff] }
  0xdc   : > { %519 = vst [vmem:[#allocation11 + $0x8] sm:$0xff] %v517_v25 }
  0xdd PF: > { %p755_p2 = scmp.eq.s32.totalorder %s1089_s24, 1  ;;  %s531_s25 = sshll.u32 %s1243_s5, 4  ;;  %s532_s25 = int_to_ptr.hbm [resolvable:$true] %s531_s25 }
  0xde   : > { %s1027_s9 = smov [#allocation11]   ;;  %s1028_s14 = smov 128  }
  0xdf   : > { %s529_s13 = sshll.u32 %s1027_s9, 4  ;;  %s1029_s0 = smov 8   ;;  %s530_s13 = int_to_ptr.vmem [resolvable:$true] %s529_s13 }
  0xe0   : > { %738 = dma.vmem_to_hbm [thread:$0]  (%p755_p2), %s530_s13, 256, %s532_s25, [#allocation5], %s1028_s14, %s1028_s14, %s1029_s0  }
  0xe1   : > { %997 = dma.done.wait (%p755_p2), [#allocation5], 256  }
  0xe2   : > { %999 = vsyncadd (%p755_p2), [#allocation5], 4294967040 }
  0xe3 PF: > { %s25_s23 = sadd.s32 1, %s1022_s23   ;;  %s1258_s21 = sld [smem:[#allocation16_spill]] }
  0xe4   : > { %p22_p3 = scmp.ge.s32.totalorder %s25_s23, 4   ;;  %s1259_s20 = sld [smem:[#allocation19_spill]] }
  0xe5   : > { %s1260_s24 = sld [smem:[#allocation17_spill]]  ;;  %s1262_s18 = smov %s1006_s19 }
  0xe6   : > { %s1261_s22 = sld [smem:[#allocation18_spill]] }
  0xe7   :  { %24 = sbr.rel (!%p22_p3) target bundleno = 12 (0xc), region = 126 }
  0xe9   : > { %s1263_s19 = smov %s1258_s21 }
  0xeb   : > { %s1264_s21 = smov %s1260_s24 }
  0xec   :  { %548 = vsyncpa [#allocation4], 1 }
  0xed   :  { %550 = vsyncpa [#allocation4 + $0x1], 1 }
  0xee   :  { %551 = vsyncpa [#allocation7], 1 }
  0xef   :  { %553 = vsyncpa [#allocation7 + $0x1], 1 }
  0xf0   :  { %554 = vsyncpa [#allocation10], 1 }
  0xf1   :  { %556 = vsyncpa [#allocation10 + $0x1], 1 }
  0xf2   :  { %557 = vsyncpa [#allocation5], 1 }
  0xf3   :  { %559 = vsyncpa [#allocation5 + $0x1], 1 }

</bundles_post_ra>
